<compile_context>
chip_gen: v6e
topology: v6e:2x2x1
jax: 0.10.0
libtpu: 0.0.40
codegen_flags: <defaults>
</compile_context>

<pallas_src>
import jax
import jax.numpy as jnp
from jax import lax
from jax.experimental import pallas as pl
from jax.experimental.pallas import tpu as pltpu

IN_CHANNELS = 3      # forward() hard-codes 3 channels via .view(..., 3, num_atoms)
EMBED_SIZE = 64
KSIZE = 3

# Budget for the double-buffered (input row tile + output row tile) VMEM footprint.
TILE_VMEM_BUDGET = 12 * 1024 * 1024


def _round_up(n, m):
    return ((n + m - 1) // m) * m


def _round_down(n, m):
    return (n // m) * m


def _gemm_bias_kernel(x_ref, m_ref, b_ref, o_ref):
    """x_ref: (TN, 3A) flat rows, m_ref: (3A, Cout) folded conv weights,
    b_ref: (1, Cout) bias pre-scaled by A, o_ref: (TN, Cout)."""
    o_ref[...] = (
        jnp.dot(x_ref[...], m_ref[...], preferred_element_type=jnp.float32)
        + b_ref[...]
    ).astype(o_ref.dtype)


def _fold_weights(weight, bias, num_atoms):
    """Collapse conv1d(k=3, pad=1) + sum over positions into (3A, Cout) matrix + scaled bias.

    For the channels-first view x_view[n, ci, t] (flat index p = ci*A + t):
      sum_t y[n, co, t] = A*bias[co]
                          + sum_ci [ (w0+w1+w2)[ci,co] * S_ci
                                     - w2[ci,co] * x_view[n,ci,0]
                                     - w0[ci,co] * x_view[n,ci,A-1] ]
    """
    cout = weight.shape[0]
    w_t = jnp.transpose(weight, (2, 1, 0))        # (K, Cin, Cout)
    wsum = jnp.sum(w_t, axis=0)                   # (Cin, Cout): w0+w1+w2
    m = jnp.broadcast_to(wsum[:, None, :], (IN_CHANNELS, num_atoms, cout))
    m = m.at[:, 0, :].add(-w_t[2])                # left boundary loses tap k=2
    m = m.at[:, num_atoms - 1, :].add(-w_t[0])    # right boundary loses tap k=0
    m = m.reshape(IN_CHANNELS * num_atoms, cout)  # row index p = ci*A + t
    b_scaled = (bias * jnp.float32(num_atoms)).reshape(1, cout)
    return m, b_scaled


def custom_embedding_forward(x, weight, bias):
    """x: (B, block, num_atoms, 3) float32
       weight: (Cout, Cin, K) = (64, 3, 3), bias: (Cout,) = (64,)
       returns: (B, block, Cout)"""
    B, BLK, A, last = x.shape
    assert last == IN_CHANNELS, "forward() requires trailing dim == 3"
    N = B * BLK
    cout = weight.shape[0]
    F = IN_CHANNELS * A

    # Flat rows: identical bytes to the PyTorch .view(N, 3, A); no transpose, no pad.
    xf = jnp.reshape(x, (N, F))

    # Tiny parameter fold (3*A x 64); done once outside the data path.
    m, b_scaled = _fold_weights(weight, bias, A)

    # VMEM-budget-derived row tile: 2 (double-buffer) * TN * (F + Cout) * 4 B <= budget.
    per_row_bytes = 4 * (F + cout)
    tn = _round_down(TILE_VMEM_BUDGET // (2 * per_row_bytes), 8)
    tn = max(8, min(tn, _round_up(N, 8)))
    grid = pl.cdiv(N, tn)

    cost = pl.CostEstimate(
        flops=2 * N * F * cout,
        transcendentals=0,
        bytes_accessed=4 * (N * F + F * cout + cout + N * cout),
    )

    out = pl.pallas_call(
        _gemm_bias_kernel,
        out_shape=jax.ShapeDtypeStruct((N, cout), jnp.float32),
        grid=(grid,),
        in_specs=[
            pl.BlockSpec((tn, F), lambda i: (i, 0)),        # batched flat rows
            pl.BlockSpec((F, cout), lambda i: (0, 0)),      # folded weights, VMEM-resident
            pl.BlockSpec((1, cout), lambda i: (0, 0)),      # scaled bias, VMEM-resident
        ],
        out_specs=pl.BlockSpec((tn, cout), lambda i: (i, 0)),
        compiler_params=pltpu.CompilerParams(
            dimension_semantics=("parallel",),
            vmem_limit_bytes=32 * 1024 * 1024,
        ),
        cost_estimate=cost,
    )(xf, m, b_scaled)

    return out.reshape(B, BLK, cout)


def _reference_forward(x, weight, bias):
    """Pure-JAX reference mirroring the PyTorch module exactly."""
    B, BLK, A, _ = x.shape
    N = B * BLK
    xr = jnp.reshape(x, (N, IN_CHANNELS, A))                       # torch .view -> NCH
    y = lax.conv_general_dilated(
        xr, weight, window_strides=(1,), padding=((1, 1),),
        dimension_numbers=("NCH", "OIH", "NCH"))
    y = y + bias[None, :, None]
    return jnp.sum(y, axis=2).reshape(B, BLK, -1)


if __name__ == "__main__":
    key = jax.random.PRNGKey(0)
    kx, kw, kb = jax.random.split(key, 3)

    # Small shapes implied by forward(): (batch, block, num_atoms, 3)
    B, BLK, A = 2, 8, 16
    x = jax.random.normal(kx, (B, BLK, A, IN_CHANNELS), dtype=jnp.float32)

    # Deterministic parameter init (Conv1d(3, 64, kernel_size=3) shapes)
    fan_in = IN_CHANNELS * KSIZE
    bound = 1.0 / (fan_in ** 0.5)
    weight = jax.random.uniform(kw, (EMBED_SIZE, IN_CHANNELS, KSIZE),
                                dtype=jnp.float32, minval=-bound, maxval=bound)
    bias = jax.random.uniform(kb, (EMBED_SIZE,), dtype=jnp.float32,
                              minval=-bound, maxval=bound)

    out = jax.jit(custom_embedding_forward)(x, weight, bias)
    out = jax.block_until_ready(out)

    ref = _reference_forward(x, weight, bias)
    assert out.shape == (B, BLK, EMBED_SIZE), out.shape
    assert jnp.allclose(out, ref, rtol=1e-5, atol=1e-5), "mismatch vs reference"

    print("KERNEL_OK")
</pallas_src>

<mosaic_0001>
module attributes {stable_mosaic.version = 11 : i64} {
  func.func @_gemm_bias_kernel(%arg0: i32, %arg1: memref<16x48xf32, #tpu.memory_space<vmem>>, %arg2: memref<48x64xf32, #tpu.memory_space<vmem>>, %arg3: memref<1x64xf32, #tpu.memory_space<vmem>>, %arg4: memref<16x64xf32, #tpu.memory_space<vmem>>) attributes {dimension_semantics = [#tpu.dimension_semantics<parallel>], iteration_bounds = array<i64: 1>, scalar_prefetch = 0 : i64, scratch_operands = 0 : i64, tpu.core_type = #tpu.core_type<tc>, window_params = [{transform_indices = @transform_0, window_bounds = array<i64: 16, 48>}, {pipeline_mode = #tpu.pipeline_mode<synchronous>, transform_indices = @transform_1, window_bounds = array<i64: 48, 64>}, {pipeline_mode = #tpu.pipeline_mode<synchronous>, transform_indices = @transform_2, window_bounds = array<i64: 1, 64>}, {transform_indices = @transform_3, window_bounds = array<i64: 16, 64>}]} {
    %c0 = arith.constant 0 : index
    %c0_0 = arith.constant 0 : index
    %0 = vector.load %arg1[%c0, %c0_0] : memref<16x48xf32, #tpu.memory_space<vmem>>, vector<16x48xf32>
    %c0_1 = arith.constant 0 : index
    %c0_2 = arith.constant 0 : index
    %1 = vector.load %arg2[%c0_1, %c0_2] : memref<48x64xf32, #tpu.memory_space<vmem>>, vector<48x64xf32>
    %cst = arith.constant dense<0.000000e+00> : vector<16x64xf32>
    %2 = tpu.matmul %0, %1, %cst {dimension_numbers = #tpu.dot_dimension_numbers<[1], [0], [0], [1], [0, 0, 1, 1], [], []>} : vector<16x48xf32>, vector<48x64xf32>, vector<16x64xf32> -> vector<16x64xf32>
    %c0_3 = arith.constant 0 : index
    %c0_4 = arith.constant 0 : index
    %3 = vector.load %arg3[%c0_3, %c0_4] : memref<1x64xf32, #tpu.memory_space<vmem>>, vector<1x64xf32>
    %4 = vector.broadcast %3 : vector<1x64xf32> to vector<16x64xf32>
    %5 = arith.addf %2, %4 : vector<16x64xf32>
    %c0_5 = arith.constant 0 : index
    %c0_6 = arith.constant 0 : index
    %6 = vector.load %arg4[%c0_5, %c0_6] : memref<16x64xf32, #tpu.memory_space<vmem>>, vector<16x64xf32>
    tpu.vector_store %arg4[%c0_5, %c0_6], %5 {strides = array<i32>} : memref<16x64xf32, #tpu.memory_space<vmem>>, vector<16x64xf32>,
    return
  }
  func.func @transform_0(%arg0: i32) -> (i32, i32) {
    %c0_i32 = arith.constant 0 : i32
    %c0_i32_0 = arith.constant 0 : i32
    return %arg0, %c0_i32 : i32, i32
  }
  func.func @transform_1(%arg0: i32) -> (i32, i32) {
    %c0_i32 = arith.constant 0 : i32
    %c0_i32_0 = arith.constant 0 : i32
    %c0_i32_1 = arith.constant 0 : i32
    return %c0_i32, %c0_i32_0 : i32, i32
  }
  func.func @transform_2(%arg0: i32) -> (i32, i32) {
    %c0_i32 = arith.constant 0 : i32
    %c0_i32_0 = arith.constant 0 : i32
    %c0_i32_1 = arith.constant 0 : i32
    return %c0_i32, %c0_i32_0 : i32, i32
  }
  func.func @transform_3(%arg0: i32) -> (i32, i32) {
    %c0_i32 = arith.constant 0 : i32
    %c0_i32_0 = arith.constant 0 : i32
    return %arg0, %c0_i32 : i32, i32
  }
}

</mosaic_0001>

<bundles_post_ra>
// kernel: custom_embedding_forward.1
= control target key start
LH: loop header
LB: loop body
LE: loop exit
PB: predicated region body
PF: predicated region fallthrough
CT: control target
= control target key end

     0   :  { %vm30_vm0 = vcmask 392192   ;;  %s237_s0 = inlined_call_operand.vmem [shape: f32[16,48], index: 0, kind: input, shape index: {}]   ;;  %s238_s1 = inlined_call_operand.vmem [shape: f32[48,64], index: 1, kind: input, shape index: {}]   ;;  %s239_s2 = inlined_call_operand.vmem [shape: f32[1,64], index: 2, kind: input, shape index: {}]   ;;  %s240_s3 = inlined_call_operand.hbm [shape: f32[16,64], index: 3, kind: output, shape index: {}]  }
   0x1   :  { %v22_v0 = vld [vmem:[%s238_s1 + $0x28] sm:$0xff]  ;;  %v21_v1 = vld [vmem:[%s238_s1 + $0x20] sm:$0xff]  ;;  %v20_v2 = vld [vmem:[%s238_s1 + $0x18] sm:$0xff] }
   0x2   :  { %142 = vmatprep.subr.mxu0 %v22_v0  ;;  %v15_v3 = vld [vmem:[%s237_s0] sm:$0xff] }
   0x3   :  { %143 = vmatpush3.msra.mxu0 %v22_v0 }
   0x4   :  { %8 = vsyncpa [#allocation3], 0  ;;  %144 = vmatprep.subr.mxu0 %v21_v1  ;;  %154 = vmatprep.mubr.msk.f32.mxu0 %vm30_vm0, %v15_v3  ;;  %v19_v4 = vld [vmem:[%s238_s1 + $0x10] sm:$0xff]  ;;  %v18_v5 = vld [vmem:[%s238_s1 + $0x8] sm:$0xff]  ;;  %s182_s30 = smov [#allocation2]   ;;  %vm112_vm1 = vcmask 523264  }
   0x5   :  { %145 = vmatpush3.msra.mxu0 %v21_v1  ;;  %v17_v6 = vld [vmem:[%s238_s1] sm:$0xff]  ;;  %v16_v7 = vld [vmem:[%s237_s0 + $0x8] sm:$0xff]  ;;  %s120_s4 = sshll.u32 %s182_s30, 4  ;;  %s121_s4 = int_to_ptr.vmem [resolvable:$true] %s120_s4 }
   0x6   :  { %146 = vmatprep.subr.mxu0 %v20_v2  ;;  %v131_v8 = vld [vmem:[%s239_s2] ss:$0 sm:$0xff]  ;;  %s160_s1 = scalar_lea.vmem %s121_s4, 256  ;;  %p165_p1 = scmp.lt.s32.totalorder %s121_s4, %s121_s4 }
   0x7   :  { %147 = vmatpush3.msra.mxu0 %v20_v2  ;;  %p161_p0 = scmp.ne.s32.totalorder %s121_s4, %s160_s1  ;;  %p166_p2 = scmp.lt.s32.totalorder %s160_s1, %s160_s1 }
   0x8   :  { %148 = vmatprep.subr.mxu0 %v19_v4 }
   0x9   :  { %149 = vmatpush3.msra.mxu0 %v19_v4  ;;  %p167_p3 = por %p166_p2, %p165_p1 }
   0xa   :  { %150 = vmatprep.subr.mxu0 %v18_v5 }
   0xb   :  { %151 = vmatpush3.msra.mxu0 %v18_v5  ;;  %p168_p4 = pnand %p167_p3, %p161_p0 }
   0xc   :  { %152 = vmatprep.subr.mxu0 %v17_v6 }
   0xd   :  { %153 = vmatpush3.msra.mxu0 %v17_v6 }
   0xe   :  { %155 = vmatmul.mubr.msk.f32.vlgmr.msra.gmra.mxu0 %vm30_vm0, %v16_v7 }
  0xce   :  { %v156_v9 = vpop.f32.mrf.mxu0 }
  0xcf   :  { %v109_v10 = vadd.f32 %v156_v9, %v131_v8 }
  0xd0   :  { %v103_v11 = vpop.f32.mrf.mxu0 }
  0xd1   :  { %114 = vst.msk [vmem:[#allocation2 + $0x8] sm:$0xff] %vm112_vm1, %v109_v10  ;;  %v104_v12 = vadd.f32 %v131_v8, %v103_v11 }
  0xd3   :  { %113 = vst.msk [vmem:[#allocation2] sm:$0xff] %vm112_vm1, %v104_v12 }
  0xd4   :  { %171 = shalt.err (!%p168_p4)
}
  0xd5   :  { %s183_s0 = smov 128   ;;  %s184_s5 = smov 8  }
  0xd6   :  { %126 = dma.vmem_to_hbm [thread:$0]  %s121_s4, 256, %s240_s3, [#allocation3], %s183_s0, %s183_s0, %s184_s5  }
  0xd7   :  { %180 = dma.done.wait [#allocation3], 256  }
  0xd8   :  { %181 = vsyncadd [#allocation3], 4294967040 }
  0xd9   :  { %130 = vsyncpa [#allocation3], 1 }

</bundles_post_ra>
